<compile_context>
chip_gen: v7x
topology: tpu7x:2x2x1
jax: 0.10.0
libtpu: 0.0.40
codegen_flags: <defaults>
</compile_context>

<pallas_src>
import jax
import jax.numpy as jnp
from jax.experimental import pallas as pl
from jax.experimental.pallas import tpu as pltpu

IN_DIM = 728
HID_DIM = 128
OUT_DIM = 10


def mlp_kernel(x_ref, w1_ref, b1_ref, w2_ref, b2_ref, o_ref):
    # fc1: (TB, 728) bf16 @ (728, 128) bf16 -> f32 accumulate on the MXU.
    x = x_ref[...].astype(jnp.bfloat16)          # cast the streamed tile in-kernel
    h = jnp.dot(x, w1_ref[...], preferred_element_type=jnp.float32)
    h = jnp.maximum(h + b1_ref[...], 0.0)        # bias + ReLU on the VPU
    # fc2: (TB, 128) bf16 @ (128, 10) bf16 -> f32 accumulate.
    out = jnp.dot(h.astype(jnp.bfloat16), w2_ref[...],
                  preferred_element_type=jnp.float32)
    o_ref[...] = (out + b2_ref[...]).astype(o_ref.dtype)


def simple_nn_forward(x, w1, b1, w2, b2, *, tb=1024):
    """out = fc2(relu(fc1(x))).

    x: (B, 728) f32. w1: (728, 128), b1: (128,), w2: (128, 10), b2: (10,)
    (already transposed from PyTorch's (out, in) to the x @ W convention).
    """
    B = x.shape[0]

    # ---- batch tiling: tile must be a multiple of 8 (sublane) or the full dim.
    if B <= 8:
        tile = b_pad = B                         # single full-batch block
    else:
        b_pad = pl.cdiv(B, 8) * 8
        tile = min(tb, b_pad)
        # Keep >=2 grid steps when the batch allows it, so the "parallel" batch
        # axis can shard across v7x's two TensorCores.
        if b_pad // tile < 2 and b_pad >= 16:
            tile = max(8, (b_pad // 2) // 8 * 8)
        b_pad = pl.cdiv(b_pad, tile) * tile

    if b_pad != B:                               # only ragged batches pay this pad
        x = jnp.pad(x, ((0, b_pad - B), (0, 0)))

    # Tiny one-time casts (weights ~186 KiB total); the big operand (x) is NOT
    # copied/cast in the wrapper.
    w1b = w1.astype(jnp.bfloat16)
    w2b = w2.astype(jnp.bfloat16)
    b1r = b1.reshape(1, HID_DIM).astype(jnp.float32)
    b2r = b2.reshape(1, OUT_DIM).astype(jnp.float32)

    flops = 2 * b_pad * (IN_DIM * HID_DIM + HID_DIM * OUT_DIM)
    bytes_accessed = (b_pad * IN_DIM * 4 + b_pad * OUT_DIM * 4
                      + (IN_DIM * HID_DIM + HID_DIM * OUT_DIM) * 2
                      + (HID_DIM + OUT_DIM) * 4)

    resident = pl.Buffered(1)                    # weights/biases: no double-buffer

    out = pl.pallas_call(
        mlp_kernel,
        out_shape=jax.ShapeDtypeStruct((b_pad, OUT_DIM), jnp.float32),
        grid_spec=pltpu.PrefetchScalarGridSpec(
            num_scalar_prefetch=0,
            grid=(b_pad // tile,),
            in_specs=[
                pl.BlockSpec((tile, IN_DIM), lambda i: (i, 0)),      # x: streamed
                pl.BlockSpec((IN_DIM, HID_DIM), lambda i: (0, 0),
                             pipeline_mode=resident),                # w1 resident
                pl.BlockSpec((1, HID_DIM), lambda i: (0, 0),
                             pipeline_mode=resident),                # b1
                pl.BlockSpec((HID_DIM, OUT_DIM), lambda i: (0, 0),
                             pipeline_mode=resident),                # w2
                pl.BlockSpec((1, OUT_DIM), lambda i: (0, 0),
                             pipeline_mode=resident),                # b2
            ],
            out_specs=pl.BlockSpec((tile, OUT_DIM), lambda i: (i, 0)),
        ),
        compiler_params=pltpu.CompilerParams(
            dimension_semantics=("parallel",),   # megacore-shard batch on v7x
        ),
        cost_estimate=pl.CostEstimate(flops=flops, transcendentals=0,
                                      bytes_accessed=bytes_accessed),
    )(x, w1b, b1r, w2b, b2r)

    return out if b_pad == B else out[:B]


def init_params(key):
    """Synthetic params matching nn.Linear(728,128) / nn.Linear(128,10).

    PyTorch stores weight as (out, in); build that then transpose to (in, out)
    for the kernel's x @ W convention.
    """
    k1, k2, k3, k4 = jax.random.split(key, 4)
    bound1 = 1.0 / jnp.sqrt(IN_DIM)
    bound2 = 1.0 / jnp.sqrt(HID_DIM)
    w1_pt = jax.random.uniform(k1, (HID_DIM, IN_DIM), jnp.float32, -bound1, bound1)
    b1 = jax.random.uniform(k2, (HID_DIM,), jnp.float32, -bound1, bound1)
    w2_pt = jax.random.uniform(k3, (OUT_DIM, HID_DIM), jnp.float32, -bound2, bound2)
    b2 = jax.random.uniform(k4, (OUT_DIM,), jnp.float32, -bound2, bound2)
    return w1_pt.T, b1, w2_pt.T, b2


def reference_forward(x, w1, b1, w2, b2):
    """f32 reference mirroring the kernel's bf16 casts (for a tight tolerance)."""
    xb = x.astype(jnp.bfloat16).astype(jnp.float32)
    w1b = w1.astype(jnp.bfloat16).astype(jnp.float32)
    w2b = w2.astype(jnp.bfloat16).astype(jnp.float32)
    h = jnp.maximum(xb @ w1b + b1, 0.0)
    hb = h.astype(jnp.bfloat16).astype(jnp.float32)
    return hb @ w2b + b2


if __name__ == "__main__":
    key = jax.random.PRNGKey(0)
    kx, kp = jax.random.split(key)

    B = 64
    x = jax.random.normal(kx, (B, IN_DIM), jnp.float32)
    w1, b1, w2, b2 = init_params(kp)

    out = simple_nn_forward(x, w1, b1, w2, b2)   # tile clamps to 32 -> grid of 2
    out = jax.block_until_ready(out)

    ref = reference_forward(x, w1, b1, w2, b2)
    assert out.shape == (B, OUT_DIM), out.shape
    max_err = float(jnp.max(jnp.abs(out - ref)))
    assert jnp.allclose(out, ref, atol=2e-2, rtol=2e-2), f"mismatch vs reference: {max_err}"

    print("KERNEL_OK")
</pallas_src>

<mosaic_0001>
module attributes {stable_mosaic.version = 11 : i64} {
  func.func @mlp_kernel(%arg0: i32, %arg1: memref<32x728xf32, #tpu.memory_space<vmem>>, %arg2: memref<728x128xbf16, #tpu.memory_space<vmem>>, %arg3: memref<1x128xf32, #tpu.memory_space<vmem>>, %arg4: memref<128x10xbf16, #tpu.memory_space<vmem>>, %arg5: memref<1x10xf32, #tpu.memory_space<vmem>>, %arg6: memref<32x10xf32, #tpu.memory_space<vmem>>) attributes {dimension_semantics = [#tpu.dimension_semantics<parallel>], iteration_bounds = array<i64: 2>, scalar_prefetch = 0 : i64, scratch_operands = 0 : i64, tpu.core_type = #tpu.core_type<tc>, window_params = [{transform_indices = @transform_0, window_bounds = array<i64: 32, 728>}, {pipeline_mode = #tpu.pipeline_mode<synchronous>, transform_indices = @transform_1, window_bounds = array<i64: 728, 128>}, {pipeline_mode = #tpu.pipeline_mode<synchronous>, transform_indices = @transform_2, window_bounds = array<i64: 1, 128>}, {pipeline_mode = #tpu.pipeline_mode<synchronous>, transform_indices = @transform_3, window_bounds = array<i64: 128, 10>}, {pipeline_mode = #tpu.pipeline_mode<synchronous>, transform_indices = @transform_4, window_bounds = array<i64: 1, 10>}, {transform_indices = @transform_5, window_bounds = array<i64: 32, 10>}]} {
    %c0 = arith.constant 0 : index
    %c0_0 = arith.constant 0 : index
    %0 = vector.load %arg1[%c0, %c0_0] : memref<32x728xf32, #tpu.memory_space<vmem>>, vector<32x728xf32>
    %1 = arith.truncf %0 : vector<32x728xf32> to vector<32x728xbf16>
    %c0_1 = arith.constant 0 : index
    %c0_2 = arith.constant 0 : index
    %2 = vector.load %arg2[%c0_1, %c0_2] : memref<728x128xbf16, #tpu.memory_space<vmem>>, vector<728x128xbf16>
    %cst = arith.constant dense<0.000000e+00> : vector<32x128xf32>
    %3 = tpu.matmul %1, %2, %cst {dimension_numbers = #tpu.dot_dimension_numbers<[1], [0], [0], [1], [0, 0, 1, 1], [], []>} : vector<32x728xbf16>, vector<728x128xbf16>, vector<32x128xf32> -> vector<32x128xf32>
    %c0_3 = arith.constant 0 : index
    %c0_4 = arith.constant 0 : index
    %4 = vector.load %arg3[%c0_3, %c0_4] : memref<1x128xf32, #tpu.memory_space<vmem>>, vector<1x128xf32>
    %5 = vector.broadcast %4 : vector<1x128xf32> to vector<32x128xf32>
    %6 = arith.addf %3, %5 : vector<32x128xf32>
    %cst_5 = arith.constant 0.000000e+00 : f32
    %7 = vector.broadcast %cst_5 : f32 to vector<32x128xf32>
    %8 = arith.maximumf %6, %7 : vector<32x128xf32>
    %9 = arith.truncf %8 : vector<32x128xf32> to vector<32x128xbf16>
    %c0_6 = arith.constant 0 : index
    %c0_7 = arith.constant 0 : index
    %10 = vector.load %arg4[%c0_6, %c0_7] : memref<128x10xbf16, #tpu.memory_space<vmem>>, vector<128x10xbf16>
    %cst_8 = arith.constant dense<0.000000e+00> : vector<32x10xf32>
    %11 = tpu.matmul %9, %10, %cst_8 {dimension_numbers = #tpu.dot_dimension_numbers<[1], [0], [0], [1], [0, 0, 1, 1], [], []>} : vector<32x128xbf16>, vector<128x10xbf16>, vector<32x10xf32> -> vector<32x10xf32>
    %c0_9 = arith.constant 0 : index
    %c0_10 = arith.constant 0 : index
    %12 = vector.load %arg5[%c0_9, %c0_10] : memref<1x10xf32, #tpu.memory_space<vmem>>, vector<1x10xf32>
    %13 = vector.broadcast %12 : vector<1x10xf32> to vector<32x10xf32>
    %14 = arith.addf %11, %13 : vector<32x10xf32>
    %c0_11 = arith.constant 0 : index
    %c0_12 = arith.constant 0 : index
    %15 = vector.load %arg6[%c0_11, %c0_12] : memref<32x10xf32, #tpu.memory_space<vmem>>, vector<32x10xf32>
    tpu.vector_store %arg6[%c0_11, %c0_12], %14 {strides = array<i32>} : memref<32x10xf32, #tpu.memory_space<vmem>>, vector<32x10xf32>,
    return
  }
  func.func @transform_0(%arg0: i32) -> (i32, i32) {
    %c0_i32 = arith.constant 0 : i32
    %c0_i32_0 = arith.constant 0 : i32
    return %arg0, %c0_i32 : i32, i32
  }
  func.func @transform_1(%arg0: i32) -> (i32, i32) {
    %c0_i32 = arith.constant 0 : i32
    %c0_i32_0 = arith.constant 0 : i32
    %c0_i32_1 = arith.constant 0 : i32
    return %c0_i32, %c0_i32_0 : i32, i32
  }
  func.func @transform_2(%arg0: i32) -> (i32, i32) {
    %c0_i32 = arith.constant 0 : i32
    %c0_i32_0 = arith.constant 0 : i32
    %c0_i32_1 = arith.constant 0 : i32
    return %c0_i32, %c0_i32_0 : i32, i32
  }
  func.func @transform_3(%arg0: i32) -> (i32, i32) {
    %c0_i32 = arith.constant 0 : i32
    %c0_i32_0 = arith.constant 0 : i32
    %c0_i32_1 = arith.constant 0 : i32
    return %c0_i32, %c0_i32_0 : i32, i32
  }
  func.func @transform_4(%arg0: i32) -> (i32, i32) {
    %c0_i32 = arith.constant 0 : i32
    %c0_i32_0 = arith.constant 0 : i32
    %c0_i32_1 = arith.constant 0 : i32
    return %c0_i32, %c0_i32_0 : i32, i32
  }
  func.func @transform_5(%arg0: i32) -> (i32, i32) {
    %c0_i32 = arith.constant 0 : i32
    %c0_i32_0 = arith.constant 0 : i32
    return %arg0, %c0_i32 : i32, i32
  }
}

</mosaic_0001>

<bundles_post_ra>
// kernel: tpu_custom_call.1
= control target key start
LH: loop header
LB: loop body
LE: loop exit
PB: predicated region body
PF: predicated region fallthrough
CT: control target
= control target key end

     0   :  { %10 = vsyncpa [#allocation3], 0  ;;  %s1659_s0 = inlined_call_operand.hbm [shape: f32[64,728], index: 0, kind: input, shape index: {}]   ;;  %s1660_s1 = inlined_call_operand.hbm [shape: bf16[728,128], index: 1, kind: input, shape index: {}]   ;;  %s1661_s2 = inlined_call_operand.vmem [shape: f32[1,128], index: 2, kind: input, shape index: {}]   ;;  %s1662_s3 = inlined_call_operand.vmem [shape: bf16[128,10], index: 3, kind: input, shape index: {}]   ;;  %s1663_s4 = inlined_call_operand.vmem [shape: f32[1,10], index: 4, kind: input, shape index: {}]   ;;  %s1664_s5 = inlined_call_operand.vmem [shape: f32[64,10], index: 5, kind: output, shape index: {}]  }
   0x1   :  { %12 = vsyncpa [#allocation3 + $0x1], 0 }
   0x2   :  { %13 = vsyncpa [#allocation5], 0  ;;  %s1442_s18 = smov 0   ;;  %s1444_s19 = smov 0  }
   0x3   :  { %s1446_s20 = smov 0   ;;  %s1448_s21 = smov 0  }
   0x4 LB: > { %s1037_s22 = sadd.s32 4294967295, %s1403_s21   ;;  %p39_p0 = scmp.ne.s32.totalorder %s1395_s19, %s1391_s18  ;;  %s1403_s21 = sphi %s1448_s21, %s1680_s21   ;;  %s1399_s20 = sphi %s1446_s20, %s1679_s20   ;;  %s1395_s19 = sphi %s1444_s19, %s1678_s19   ;;  %s1391_s18 = sphi %s1442_s18, %s1677_s18  }
   0x5   : > { %p1464_p1 = scmp.eq.s32.totalorder %s1037_s22, 0  ;;  %p1039_p2 = scmp.ge.s32.totalorder %s1403_s21, 1 }
   0x6   : > { %p160_p3 = scmp.lt.s32.totalorder %s1403_s21, 3  ;;  %s1405_s26 = smov [#allocation4]  }
   0x7   : > { %s1669_s23 = scalar_select %p1464_p1, 1, 0 }
   0x8   : > { %p1472_p4 = por %p1464_p1, %p39_p0  ;;  %p1476_p5 = pnand %p1039_p2, %p160_p3 }
   0x9   : > { %s172_s27 = sshll.u32 %s1405_s26, 4  ;;  %s1489_s29 = sadd.s32 1, %s1403_s21   ;;  %s173_s27 = int_to_ptr.vmem [resolvable:$true] %s172_s27 }
   0xa   : > { %s1670_s24 = scalar_select %p1472_p4, 1, 0 }
   0xb   : > { %s1671_s25 = scalar_select %p1476_p5, 1, 0 }
   0xc   : > { %p1204_p6 = pneg %p1476_p5  ;;  %s26_s30 = sadd.s32 1, %s1399_s20 }
   0xd   : > { %s23_s6 = ssub.s32 %s1403_s21, %s1489_s29  ;;  %s1307_s9 = scalar_lea.hbm %s1660_s1, 5824 }
   0xe   : > { %p1484_p7 = pnand %p1204_p6, %p1464_p1  ;;  %p1308_p8 = scmp.ne.s32.totalorder %s1660_s1, %s1307_s9 }
   0xf   : > { %p1314_p12 = scmp.lt.u32.totalorder %s1307_s9, %s1660_s1 }
  0x10   : > { %p1309_p9 = pneg %p1484_p7 }
  0x12   : > { %p1310_p10 = pnand %p1309_p9, %p1308_p8 }
  0x14   : > { %p1311_p11 = pneg %p1310_p10 }
  0x16   : > { %p1316_p13 = pnand %p1314_p12, %p1311_p11 }
  0x18   : > { %1319 = shalt.err (!%p1316_p13)
}
  0x19   : > { %s1320_s14 = scalar_lea.vmem %s173_s27, 5824  ;;  %p1328_p6 = scmp.lt.s32.totalorder %s173_s27, %s173_s27 }
  0x1a   : > { %p1321_p0 = scmp.ne.s32.totalorder %s173_s27, %s1320_s14  ;;  %p1329_p1 = scmp.lt.s32.totalorder %s1320_s14, %s1320_s14 }
  0x1c   : > { %p1323_p2 = pnand %p1321_p0, %p1309_p9  ;;  %p1330_p4 = por %p1329_p1, %p1328_p6 }
  0x1e   : > { %p1324_p3 = pneg %p1323_p2 }
  0x20   : > { %p1331_p5 = pnand %p1330_p4, %p1324_p3 }
  0x22   : > { %1334 = shalt.err (!%p1331_p5)
}
  0x23   : > { %s1406_s15 = smov 64   ;;  %s1407_s16 = smov 4  }
  0x24   : > { %1207 = dma.hbm_to_vmem [thread:$0]  (!%p1484_p7), %s1660_s1, 5824, %s173_s27, [#allocation5], %s1406_s15, %s1406_s15, %s1407_s16  }
  0x25   : > { %p24_p8 = scmp.eq.s32.totalorder %s23_s6, 0  ;;  %p33_p9 = scmp.ne.s32.totalorder %s1399_s20, %s1395_s19 }
  0x26   : > { %p34_p1 = scmp.eq.s32.totalorder %s1403_s21, 0  ;;  %p1213_p4 = scmp.lt.s32.totalorder %s1403_s21, 2 }
  0x27   : > { %s1515_s26 = scalar_select %p24_p8, %s1399_s20, %s26_s30  }
  0x28   : > { %p35_p5 = por %p34_p1, %p33_p9  ;;  %s195_s7 = sand.u32 1, %s1399_s20  }
  0x29   : > { %s1195_s8 = smul.u32 192, %s195_s7  ;;  %s1530_s12 = scalar_lea.sflag [#allocation3], %s195_s7 }
  0x2a   : > { %s1196_s9 = smul.u32 3072, %s1403_s21  ;;  %p1519_p10 = pnand %p1213_p4, %p35_p5 }
  0x2b   : > { %s199_s30 = scalar_lea.vmem [#allocation2], %s1195_s8  ;;  %s1340_s16 = scalar_lea.hbm %s1659_s0, 6144 }
  0x2c   : > { %s1526_s27 = scalar_lea.hbm %s1659_s0, %s1196_s9  ;;  %s207_s6 = sshll.u32 %s199_s30, 4  ;;  %s1528_s6 = int_to_ptr.vmem [resolvable:$true] %s207_s6 }
  0x2d   : > { %s1335_s13 = scalar_lea.hbm %s1526_s27, 3072  ;;  %p1337_p11 = pneg %p1519_p10 }
  0x2e   : > { %p1336_p7 = scmp.ne.s32.totalorder %s1526_s27, %s1335_s13  ;;  %p1341_p0 = scmp.lt.u32.totalorder %s1526_s27, %s1659_s0 }
  0x2f   : > { %p1342_p2 = scmp.lt.u32.totalorder %s1340_s16, %s1335_s13  ;;  %p1344_p6 = scmp.lt.u32.totalorder %s1335_s13, %s1526_s27 }
  0x30   : > { %p1338_p12 = pnand %p1337_p11, %p1336_p7 }
  0x31   : > { %p1343_p3 = por %p1342_p2, %p1341_p0 }
  0x32   : > { %p1339_p13 = pneg %p1338_p12 }
  0x33   : > { %p1345_p8 = por %p1344_p6, %p1343_p3 }
  0x35   : > { %p1346_p9 = pnand %p1345_p8, %p1339_p13 }
  0x37   : > { %1349 = shalt.err (!%p1346_p9)
}
  0x38   : > { %s1350_s7 = scalar_lea.vmem %s1528_s6, 3072  ;;  %s1408_s8 = smov [#allocation2]  }
  0x39   : > { %p1351_p1 = scmp.ne.s32.totalorder %s1528_s6, %s1350_s7  ;;  %s1355_s9 = sshll.u32 %s1408_s8, 4  ;;  %s1356_s9 = int_to_ptr.vmem [resolvable:$false] %s1355_s9 }
  0x3a   : > { %s1357_s11 = scalar_lea.vmem %s1356_s9, 6144  ;;  %p1358_p7 = scmp.lt.s32.totalorder %s1528_s6, %s1356_s9 }
  0x3b   : > { %p1353_p4 = pnand %p1351_p1, %p1337_p11  ;;  %p1359_p12 = scmp.lt.s32.totalorder %s1357_s11, %s1350_s7 }
  0x3d   : > { %p1354_p5 = pneg %p1353_p4  ;;  %p1360_p0 = por %p1359_p12, %p1358_p7 }
  0x3f   : > { %p1361_p2 = pnand %p1360_p0, %p1354_p5 }
  0x41   : > { %1364 = shalt.err (!%p1361_p2)
}
  0x42   : > { %s1409_s28 = smov 768   ;;  %s1410_s30 = smov 48  }
  0x43   : > { %1211 = dma.hbm_to_vmem [thread:$0]  (!%p1519_p10), %s1526_s27, 3072, %s1528_s6, %s1530_s12, %s1409_s28, %s1409_s28, %s1410_s30  }
  0x44   : > { %p1674_p11 = scmp.ne.s32.totalorder %s1671_s25, 0 }
  0x45   : > { %s221_s13 = sand.u32 (!%p1674_p11), 1, %s1395_s19   ;;  %p1675_p13 = scmp.ne.s32.totalorder (!%p1674_p11), %s1670_s24, 0 }
  0x46   : > { %219 = sbr.rel (%p1674_p11) target bundleno = 616 (0x268), region = 40  ;;  %s222_s15 = scalar_lea.sflag (!%p1674_p11), [#allocation3], %s221_s13 }
  0x47   : > { %s1197_s14 = smul.u32 (!%p1674_p11), 192, %s221_s13 }
  0x49   : > { %s1561_s16 = scalar_lea.vmem (!%p1674_p11), [#allocation2], %s1197_s14 }
  0x4d   : > { %1382 = dma.done.wait (%p1675_p13), %s222_s15, 3072  }
  0x4e   : > { %1384 = vsyncadd (%p1675_p13), %s222_s15, 4294964224  ;;  %p1676_p3 = scmp.ne.s32.totalorder %s1669_s23, 0 }
  0x50   : > { %1386 = dma.done.wait (%p1676_p3), [#allocation5], 5824  }
  0x51   : > { %1388 = vsyncadd (%p1676_p3), [#allocation5], 4294961472  ;;  %v1253_v0 = vld [vmem:[#allocation4 + $0x40] sm:$0xff]   ;;  %v1257_v4 = vld [vmem:[#allocation4 + $0x48] sm:$0xff]   ;;  %v1411_v36 = vmov 0   ;;  %vm671_vm0 = vcmask 719872  }
  0x52   : > { %v1254_v1 = vld [vmem:[#allocation4] sm:$0xff]   ;;  %1109 = vmatprep.subr.bf16.mxu0 %v1253_v0  ;;  %v1258_v5 = vld [vmem:[#allocation4 + $0x8] sm:$0xff]   ;;  %v1261_v8 = vld [vmem:[#allocation4 + $0x50] sm:$0xff]   ;;  %vm678_vm1 = vcmask 1043456   ;;  %vm955_vm2 = vcmask 80896  }
  0x53   : > { %v1255_v2 = vld [vmem:[#allocation4 + $0xc0] sm:$0xff]   ;;  %1110 = vmatpush3.bf16.msra.mxu0 %v1254_v1  ;;  %v1259_v6 = vld [vmem:[#allocation4 + $0xc8] sm:$0xff]   ;;  %v1262_v9 = vld [vmem:[#allocation4 + $0x10] sm:$0xff]  }
  0x54   : > { %v1256_v3 = vld [vmem:[#allocation4 + $0x80] sm:$0xff]   ;;  %1137 = vmatprep.subr.bf16.mxu1 %v1255_v2  ;;  %1111 = vmatprep.subr.bf16.mxu0 %v1257_v4  ;;  %v1260_v7 = vld [vmem:[#allocation4 + $0x88] sm:$0xff]   ;;  %v1263_v10 = vld [vmem:[#allocation4 + $0xd0] sm:$0xff]  }
  0x55   : > { %1138 = vmatpush3.bf16.msra.mxu1 %v1256_v3  ;;  %v1264_v11 = vld [vmem:[#allocation4 + $0x90] sm:$0xff]   ;;  %v1265_v12 = vld [vmem:[#allocation4 + $0x58] sm:$0xff]   ;;  %v1269_v16 = vld [vmem:[#allocation4 + $0x60] sm:$0xff]  }
  0x56   : > { %1139 = vmatprep.subr.bf16.mxu1 %v1259_v6  ;;  %v1266_v13 = vld [vmem:[#allocation4 + $0x18] sm:$0xff]   ;;  %v1270_v17 = vld [vmem:[#allocation4 + $0x20] sm:$0xff]   ;;  %v1273_v20 = vld [vmem:[#allocation4 + $0x68] sm:$0xff]  }
  0x57   : > { %1112 = vmatpush3.bf16.msra.mxu0 %v1258_v5  ;;  %v1267_v14 = vld [vmem:[#allocation4 + $0xd8] sm:$0xff]   ;;  %v1271_v18 = vld [vmem:[#allocation4 + $0xe0] sm:$0xff]   ;;  %v1274_v21 = vld [vmem:[#allocation4 + $0x28] sm:$0xff]  }
  0x58   : > { %1113 = vmatprep.subr.bf16.mxu0 %v1261_v8  ;;  %v1268_v15 = vld [vmem:[#allocation4 + $0x98] sm:$0xff]   ;;  %v1272_v19 = vld [vmem:[#allocation4 + $0xa0] sm:$0xff]   ;;  %v1275_v22 = vld [vmem:[#allocation4 + $0xe8] sm:$0xff]  }
  0x59   : > { %1140 = vmatpush3.bf16.msra.mxu1 %v1260_v7  ;;  %v1276_v23 = vld [vmem:[#allocation4 + $0xa8] sm:$0xff]   ;;  %v1277_v24 = vld [vmem:[#allocation4 + $0x70] sm:$0xff]   ;;  %v1281_v28 = vld [vmem:[#allocation4 + $0x78] sm:$0xff]  }
  0x5a   : > { %1141 = vmatprep.subr.bf16.mxu1 %v1263_v10  ;;  %v1278_v25 = vld [vmem:[#allocation4 + $0x30] sm:$0xff]   ;;  %v1282_v29 = vld [vmem:[#allocation4 + $0x38] sm:$0xff]   ;;  %v265_v31 = vld [vmem:[%s1561_s16 + $0x8] sm:$0xff] }
  0x5b   : > { %1114 = vmatpush3.bf16.msra.mxu0 %v1262_v9  ;;  %v1279_v26 = vld [vmem:[#allocation4 + $0xf0] sm:$0xff]   ;;  %v1283_v30 = vld [vmem:[#allocation4 + $0xf8] sm:$0xff]   ;;  %v264_v35 = vld [vmem:[%s1561_s16] sm:$0xff] }
  0x5c   : > { %1115 = vmatprep.subr.bf16.mxu0 %v1265_v12  ;;  %v1280_v27 = vld [vmem:[#allocation4 + $0xb0] sm:$0xff]   ;;  %v271_v32 = vld [vmem:[%s1561_s16 + $0x38] sm:$0xff]  ;;  %v273_v39 = vld [vmem:[%s1561_s16 + $0x48] sm:$0xff] }
  0x5d   : > { %1142 = vmatpush3.bf16.msra.mxu1 %v1264_v11  ;;  %v289_v33 = vpack.c.bf16 %v271_v32, %v265_v31  ;;  %v1284_v34 = vld [vmem:[#allocation4 + $0xb8] sm:$0xff]   ;;  %v270_v37 = vld [vmem:[%s1561_s16 + $0x30] sm:$0xff]  ;;  %v1285_v42 = vld [vmem:[#allocation4 + $0x100] sm:$0xff]  }
  0x5e   : > { %1143 = vmatprep.subr.bf16.mxu1 %v1267_v14  ;;  %v267_v38 = vld [vmem:[%s1561_s16 + $0x18] sm:$0xff]  ;;  %v288_v40 = vpack.c.bf16 %v270_v37, %v264_v35  ;;  %v266_v43 = vld [vmem:[%s1561_s16 + $0x10] sm:$0xff]  ;;  %v272_v44 = vld [vmem:[%s1561_s16 + $0x40] sm:$0xff] }
  0x5f   : > { %1116 = vmatpush3.bf16.msra.mxu0 %v1266_v13  ;;  %714 = vmatprep.mubr.bf16.mxu0 %v289_v33  ;;  %v291_v41 = vpack.c.bf16 %v273_v39, %v267_v38  ;;  %v290_v45 = vpack.c.bf16 %v272_v44, %v266_v43  ;;  %v1286_v46 = vld [vmem:[#allocation4 + $0x108] sm:$0xff]   ;;  %v1287_v47 = vld [vmem:[#allocation4 + $0x110] sm:$0xff]   ;;  %v1288_v48 = vld [vmem:[#allocation4 + $0x118] sm:$0xff]  }
  0x60   : > { %1117 = vmatprep.subr.bf16.mxu0 %v1269_v16  ;;  %v277_v49 = vld [vmem:[%s1561_s16 + $0x68] sm:$0xff]  ;;  %v283_v50 = vld [vmem:[%s1561_s16 + $0x98] sm:$0xff]  ;;  %v276_v51 = vld [vmem:[%s1561_s16 + $0x60] sm:$0xff] }
  0x61   : > { %1144 = vmatpush3.bf16.msra.mxu1 %v1268_v15  ;;  %763 = vmatprep.mubr.bf16.mxu1 %v291_v41  ;;  %v282_v52 = vld [vmem:[%s1561_s16 + $0x90] sm:$0xff]  ;;  %v1289_v53 = vld [vmem:[#allocation4 + $0x120] sm:$0xff]   ;;  %v295_v54 = vpack.c.bf16 %v283_v50, %v277_v49  ;;  %v279_v56 = vld [vmem:[%s1561_s16 + $0x78] sm:$0xff] }
  0x62   : > { %1145 = vmatprep.subr.bf16.mxu1 %v1271_v18  ;;  %v294_v55 = vpack.c.bf16 %v282_v52, %v276_v51  ;;  %v285_v57 = vld [vmem:[%s1561_s16 + $0xa8] sm:$0xff]  ;;  %v278_v58 = vld [vmem:[%s1561_s16 + $0x70] sm:$0xff]  ;;  %v284_v60 = vld [vmem:[%s1561_s16 + $0xa0] sm:$0xff] }
  0x63   : > { %1118 = vmatpush3.bf16.msra.mxu0 %v1270_v17  ;;  %v297_v59 = vpack.c.bf16 %v285_v57, %v279_v56  ;;  %v296_v61 = vpack.c.bf16 %v284_v60, %v278_v58  ;;  %v269_v62 = vld [vmem:[%s1561_s16 + $0x28] sm:$0xff]  ;;  %v275_v63 = vld [vmem:[%s1561_s16 + $0x58] sm:$0xff]  ;;  %v1291_v2 = vld [vmem:[#allocation4 + $0x130] sm:$0xff]  }
  0x64   : > { %1119 = vmatprep.subr.bf16.mxu0 %v1273_v20  ;;  %v293_v0 = vpack.c.bf16 %v275_v63, %v269_v62  ;;  %v1290_v1 = vld [vmem:[#allocation4 + $0x128] sm:$0xff]   ;;  %v1292_v3 = vld [vmem:[#allocation4 + $0x138] sm:$0xff]   ;;  %v1293_v4 = vld [vmem:[#allocation4 + $0x140] sm:$0xff]  }
  0x65   : > { %1146 = vmatpush3.bf16.msra.mxu1 %v1272_v19  ;;  %v1294_v5 = vld [vmem:[#allocation4 + $0x148] sm:$0xff]   ;;  %v1295_v6 = vld [vmem:[#allocation4 + $0x150] sm:$0xff]   ;;  %v1296_v7 = vld [vmem:[#allocation4 + $0x158] sm:$0xff]  }
  0x66   : > { %1147 = vmatprep.subr.bf16.mxu1 %v1275_v22  ;;  %v1297_v8 = vld [vmem:[#allocation4 + $0x160] sm:$0xff]   ;;  %v1298_v9 = vld [vmem:[#allocation4 + $0x168] ss:$0 sps:$4 sm:$0xff]   ;;  %v274_v11 = vld [vmem:[%s1561_s16 + $0x50] sm:$0xff] }
  0x67   : > { %1120 = vmatpush3.bf16.msra.mxu0 %v1274_v21  ;;  %v268_v10 = vld [vmem:[%s1561_s16 + $0x20] sm:$0xff]  ;;  %v680_v12 = vsel %vm678_vm1, %v1298_v9, 0  ;;  %v281_v13 = vld [vmem:[%s1561_s16 + $0x88] sm:$0xff]  ;;  %v287_v14 = vld [vmem:[%s1561_s16 + $0xb8] sm:$0xff] }
  0x68   : > { %1121 = vmatprep.subr.bf16.mxu0 %v1277_v24  ;;  %v292_v15 = vpack.c.bf16 %v274_v11, %v268_v10  ;;  %v299_v16 = vpack.c.bf16 %v287_v14, %v281_v13  ;;  %v280_v17 = vld [vmem:[%s1561_s16 + $0x80] sm:$0xff]  ;;  %v286_v18 = vld [vmem:[%s1561_s16 + $0xb0] sm:$0xff]  ;;  %v1300_v21 = vld [vmem:[%s1662_s3 + $0x8] sm:$0xff]   ;;  %s1047_s16 = sshll.u32 %s1037_s22, 2 }
  0x69   : > { %1148 = vmatpush3.bf16.msra.mxu1 %v1276_v23  ;;  %v298_v19 = vpack.c.bf16 %v286_v18, %v280_v17  ;;  %v1299_v20 = vld [vmem:[%s1662_s3] sm:$0xff]   ;;  %v1301_v22 = vld [vmem:[%s1662_s3 + $0x10] sm:$0xff]   ;;  %v1302_v23 = vld [vmem:[%s1662_s3 + $0x18] sm:$0xff]   ;;  %p258_p10 = scmp.lt.s32.totalorder %s1047_s16, 7 }
  0x6a   : > { %1149 = vmatprep.subr.bf16.mxu1 %v1279_v26  ;;  %v1303_v24 = vld [vmem:[%s1662_s3 + $0x20] sm:$0xff]   ;;  %v1305_v26 = vld [vmem:[%s1662_s3 + $0x30] sm:$0xff]  }
  0x6b   : > { %1122 = vmatpush3.bf16.msra.mxu0 %v1278_v25  ;;  %v1304_v25 = vld [vmem:[%s1662_s3 + $0x28] sm:$0xff]   ;;  %s1682_s16 = smov (!%p258_p10, %s1047_s16), 7 }
  0x6c   : > { %1123 = vmatprep.subr.bf16.mxu0 %v1281_v28  ;;  %s1048_s23 = sshll.u32 %s1682_s16, 3 }
  0x6d   : > { %1150 = vmatpush3.bf16.msra.mxu1 %v1280_v27  ;;  %v1306_v27 = vld [vmem:[%s1662_s3 + $0x38] sm:$0xff]   ;;  %s261_s6 = scalar_lea.vmem %s1664_s5, %s1048_s23 }
  0x6e   : > { %1151 = vmatprep.subr.bf16.mxu1 %v1283_v30 }
  0x6f   : > { %1124 = vmatpush3.bf16.msra.mxu0 %v1282_v29  ;;  %v1049_v29 = vld [vmem:[%s1661_s2] ss:$0 sm:$0xff] }
  0x70   : > { %780 = vmatprep.subr.bf16.mxu0 %v1411_v36 }
  0x71   : > { %1152 = vmatpush3.bf16.msra.mxu1 %v1284_v34 }
  0x72   : > { %715 = vmatmul.mubr.bf16.vlgmr.msra.gmra.mrb[0].mxu0 %v288_v40  ;;  %1175 = vmatprep.subr.bf16.mxu1 %v1299_v20 }
  0x73   : > { %781 = vmatpush1.bf16.msra.mxu0 %v1285_v42  ;;  %722 = vmatprep.mubr.bf16.mxu0 %v295_v54 }
  0x74   : > { %764 = vmatmul.mubr.bf16.vlgmr.msra.gmra.mrb[0].mxu1 %v290_v45  ;;  %782 = vmatprep.subr.bf16.mxu0 %v1411_v36 }
  0x75   : > { %771 = vmatprep.mubr.bf16.mxu1 %v297_v59  ;;  %1176 = vmatpush3.bf16.msra.mxu1 %v1299_v20 }
  0x76   : > { %1177 = vmatprep.subr.bf16.mxu1 %v1300_v21 }
  0x77   : > { %783 = vmatpush1.bf16.msra.mxu0 %v1286_v46 }
  0x78   : > { %784 = vmatprep.subr.bf16.mxu0 %v1411_v36 }
  0x79   : > { %1178 = vmatpush3.bf16.msra.mxu1 %v1300_v21 }
  0x7a   : > { %723 = vmatmul.mubr.bf16.gmra.mrb[4].mxu0 %v294_v55  ;;  %1179 = vmatprep.subr.bf16.mxu1 %v1301_v22 }
  0x7b   : > { %785 = vmatpush1.bf16.msra.mxu0 %v1287_v47  ;;  %1096 = vmatprep.mubr.msk.bf16.mxu0 %vm671_vm0, %v293_v0 }
  0x7c   : > { %786 = vmatprep.subr.bf16.mxu0 %v1411_v36  ;;  %772 = vmatmul.mubr.bf16.gmra.mrb[4].mxu1 %v296_v61 }
  0x7d   : > { %1180 = vmatpush3.bf16.msra.mxu1 %v1301_v22 }
  0x7e   : > { %1181 = vmatprep.subr.bf16.mxu1 %v1302_v23 }
  0x7f   : > { %787 = vmatpush1.bf16.msra.mxu0 %v1288_v48 }
  0x80   : > { %788 = vmatprep.subr.bf16.mxu0 %v1411_v36 }
  0x81   : > { %1182 = vmatpush3.bf16.msra.mxu1 %v1302_v23 }
  0x82   : > { %1183 = vmatprep.subr.bf16.mxu1 %v1303_v24 }
  0x83   : > { %789 = vmatpush1.bf16.msra.mxu0 %v1289_v53 }
  0x84   : > { %790 = vmatprep.subr.bf16.mxu0 %v1411_v36 }
  0x85   : > { %1184 = vmatpush3.bf16.msra.mxu1 %v1303_v24 }
  0x86   : > { %1185 = vmatprep.subr.bf16.mxu1 %v1304_v25 }
  0x87   : > { %791 = vmatpush1.bf16.msra.mxu0 %v1290_v1 }
  0x88   : > { %792 = vmatprep.subr.bf16.mxu0 %v1411_v36 }
  0x89   : > { %1186 = vmatpush3.bf16.msra.mxu1 %v1304_v25 }
  0x8a   : > { %1187 = vmatprep.subr.bf16.mxu1 %v1305_v26 }
  0x8b   : > { %793 = vmatpush1.bf16.msra.mxu0 %v1291_v2 }
  0x8c   : > { %794 = vmatprep.subr.bf16.mxu0 %v1411_v36 }
  0x8d   : > { %1188 = vmatpush3.bf16.msra.mxu1 %v1305_v26 }
  0x8e   : > { %1189 = vmatprep.subr.bf16.mxu1 %v1306_v27 }
  0x8f   : > { %795 = vmatpush1.bf16.msra.mxu0 %v1292_v3 }
  0x90   : > { %796 = vmatprep.subr.bf16.mxu0 %v1411_v36 }
  0x91   : > { %1190 = vmatpush3.bf16.msra.mxu1 %v1306_v27 }
  0x93   : > { %797 = vmatpush1.bf16.msra.mxu0 %v1293_v4 }
  0x94   : > { %798 = vmatprep.subr.bf16.mxu0 %v1411_v36 }
  0x97   : > { %799 = vmatpush1.bf16.msra.mxu0 %v1294_v5 }
  0x98   : > { %800 = vmatprep.subr.bf16.mxu0 %v1411_v36 }
  0x9b   : > { %801 = vmatpush1.bf16.msra.mxu0 %v1295_v6 }
  0x9c   : > { %802 = vmatprep.subr.bf16.mxu0 %v1411_v36 }
  0x9f   : > { %803 = vmatpush1.bf16.msra.mxu0 %v1296_v7 }
  0xa0   : > { %804 = vmatprep.subr.bf16.mxu0 %v1411_v36 }
  0xa3   : > { %805 = vmatpush1.bf16.msra.mxu0 %v1297_v8 }
  0xa4   : > { %806 = vmatprep.subr.bf16.mxu0 %v1411_v36 }
  0xa7   : > { %807 = vmatpush1.bf16.msra.mxu0 %v680_v12 }
  0xaa   : > { %813 = vmatmul.mubr.bf16.vlgmr.msra.gmra.mrb[8].mxu0 %v292_v15  ;;  %v1098_v15 = vld [vmem:[%s1663_s4] ss:$0 sm:$0xff] }
  0xab   : > { %1097 = vmatprep.mubr.msk.bf16.mxu0 %vm671_vm0, %v299_v16 }
  0xb2   : > { %821 = vmatmul.mubr.bf16.gmra.mrb[12].mxu0 %v298_v19 }
 0x145   : > { %v1125_v28 = vpop.f32.mrb[0].mxu0 }
 0x146   : > { %v1126_v30 = vpop.f32.mrb[1].mxu0 }
 0x147   : > { %v1127_v31 = vadd.f32 %v1126_v30, %v1125_v28  ;;  %v1128_v32 = vpop.f32.mrb[2].mxu0  ;;  %v1153_v33 = vpop.f32.mrb[0].mxu1 }
 0x148   : > { %v1129_v34 = vpop.f32.mrb[3].mxu0  ;;  %v1154_v35 = vpop.f32.mrb[1].mxu1 }
 0x149   : > { %v717_v36 = vadd.f32 %v1127_v31, %v1049_v29  ;;  %v1130_v37 = vadd.f32 %v1129_v34, %v1128_v32  ;;  %v1155_v38 = vadd.f32 %v1154_v35, %v1153_v33  ;;  %v1156_v39 = vpop.f32.mrb[2].mxu1 }
 0x14a   : > { %v1157_v40 = vpop.f32.mrb[3].mxu1 }
 0x14b   : > { %v720_v41 = vadd.f32 %v1130_v37, %v1049_v29  ;;  %v1158_v42 = vadd.f32 %v1157_v40, %v1156_v39  ;;  %v766_v43 = vadd.f32 %v1155_v38, %v717_v36 }
 0x14d   : > { %v769_v44 = vadd.f32 %v1158_v42, %v720_v41  ;;  %v1131_v45 = vpop.f32.mrb[4].mxu0 }
 0x14e   : > { %v1132_v46 = vpop.f32.mrb[5].mxu0 }
 0x14f   : > { %v1133_v47 = vadd.f32 %v1132_v46, %v1131_v45  ;;  %v1134_v48 = vpop.f32.mrb[6].mxu0  ;;  %v1159_v49 = vpop.f32.mrb[4].mxu1 }
 0x150   : > { %v1135_v50 = vpop.f32.mrb[7].mxu0  ;;  %v1160_v51 = vpop.f32.mrb[5].mxu1 }
 0x151   : > { %v725_v52 = vadd.f32 %v1133_v47, %v1049_v29  ;;  %v1136_v53 = vadd.f32 %v1135_v50, %v1134_v48  ;;  %v1161_v54 = vadd.f32 %v1160_v51, %v1159_v49  ;;  %v1162_v55 = vpop.f32.mrb[6].mxu1 }
 0x152   : > { %v1163_v56 = vpop.f32.mrb[7].mxu1 }
 0x153   : > { %v728_v57 = vadd.f32 %v1136_v53, %v1049_v29  ;;  %v1164_v58 = vadd.f32 %v1163_v56, %v1162_v55  ;;  %v774_v59 = vadd.f32 %v1161_v54, %v725_v52 }
 0x155   : > { %v777_v60 = vadd.f32 %v1164_v58, %v728_v57 }
 0x17d   : > { %v814_v61 = vpop.f32.mrb[8].mxu0 }
 0x17e   : > { %v815_v62 = vadd.f32 %v814_v61, %v766_v43  ;;  %v816_v63 = vpop.f32.mrb[9].mxu0 }
 0x17f   : > { %v817_v0 = vpop.f32.mrb[10].mxu0 }
 0x180   : > { %v818_v1 = vadd.f32 %v817_v0, %v769_v44  ;;  %v819_v2 = vpop.f32.mrb[11].mxu0  ;;  %v829_v3 = vmax.f32 %v815_v62, 0.0 }
 0x182   : > { %v830_v4 = vmax.f32 %v818_v1, 0.0 }
 0x184   : > { %v833_v5 = vpack.c.bf16 %v830_v4, %v829_v3 }
 0x185   : > { %v822_v6 = vpop.f32.mrb[12].mxu0 }
 0x186   : > { %v823_v7 = vadd.f32 %v822_v6, %v774_v59  ;;  %v824_v8 = vpop.f32.mrb[13].mxu0  ;;  %1191 = vmatprep.mubr.bf16.mxu1 %v833_v5 }
 0x187   : > { %v825_v9 = vpop.f32.mrb[14].mxu0 }
 0x188   : > { %v826_v10 = vadd.f32 %v825_v9, %v777_v60  ;;  %v827_v11 = vpop.f32.mrb[15].mxu0  ;;  %v831_v12 = vmax.f32 %v823_v7, 0.0 }
 0x18a   : > { %v832_v13 = vmax.f32 %v826_v10, 0.0 }
 0x18c   : > { %v834_v14 = vpack.c.bf16 %v832_v13, %v831_v12 }
 0x18e   : > { %1192 = vmatmul.mubr.bf16.vlgmr.msra.gmra.mrb[8].mxu1 %v834_v14 }
 0x261   : > { %v1193_v16 = vpop.f32.mrb[8].mxu1 }
 0x262   : > { %v940_v17 = vpop.f32.mrb[9].mxu1  ;;  %v949_v22 = vadd.f32 %v1193_v16, %v1098_v15 }
 0x263   : > { %v941_v18 = vadd.f32 %v1098_v15, %v940_v17  ;;  %v1194_v19 = vpop.f32.mrb[10].mxu1 }
 0x264   : > { %v943_v20 = vpop.f32.mrb[11].mxu1  ;;  %v952_v23 = vadd.f32 %v1194_v19, %v1098_v15  ;;  %958 = vst.msk [vmem:[%s261_s6 + $0x10] sm:$0xff] %vm955_vm2, %v949_v22 }
 0x265   : > { %956 = vst.msk [vmem:[%s261_s6] sm:$0xff] %vm955_vm2, %v941_v18  ;;  %v944_v21 = vadd.f32 %v1098_v15, %v943_v20 }
 0x266   : > { %959 = vst.msk [vmem:[%s261_s6 + $0x18] sm:$0xff] %vm955_vm2, %v952_v23 }
 0x267   : > { %957 = vst.msk [vmem:[%s261_s6 + $0x8] sm:$0xff] %vm955_vm2, %v944_v21 }
 0x268 PF: > { %p16_p6 = scmp.ge.s32.totalorder %s1489_s29, 4   ;;  %s1677_s18 = smov %s1395_s19 }
 0x269   : > { %s1678_s19 = smov %s1399_s20  ;;  %s1679_s20 = smov %s1515_s26 }
 0x26a   : > { %s1680_s21 = smov %s1489_s29  ;;  %18 = sbr.rel (!%p16_p6) target bundleno = 4 (0x4), region = 84 }
 0x271   :  { %982 = vsyncpa [#allocation3], 1 }
 0x272   :  { %984 = vsyncpa [#allocation3 + $0x1], 1 }
 0x273   :  { %985 = vsyncpa [#allocation5], 1 }

</bundles_post_ra>
